<compile_context>
chip_gen: v6e
topology: v6e:2x2x1
jax: 0.10.0
libtpu: 0.0.40
codegen_flags: <defaults>
</compile_context>

<pallas_src>
import functools
import numpy as np
import jax
import jax.numpy as jnp
from jax import lax
from jax.experimental import pallas as pl
from jax.experimental.pallas import tpu as pltpu

_LANE = 128


# --------------------------------------------------------------------------
# helpers
# --------------------------------------------------------------------------
def _round_up(n, m):
    return ((n + m - 1) // m) * m


def _row_tile(m, target=512):
    """Pick (tile, padded_m): tile multiple of 8, <= target; prefer >=2 grid
    steps (v7x megacore), then minimal padding, then the biggest tile."""
    m = int(m)
    m8 = _round_up(max(m, 8), 8)
    best = None
    for t in range(8, min(target, m8) + 1, 8):
        mp = _round_up(m, t)
        steps = mp // t
        key = (0 if steps >= 2 else 1, mp - m, -t)
        if best is None or key < best[0]:
            best = (key, t, mp)
    return best[1], best[2]


def _const_spec(shape):
    """BlockSpec for weights whose block index never changes: single-buffer."""
    nd = len(shape)
    idx = lambda *_: (0,) * nd
    try:
        return pl.BlockSpec(shape, idx, pipeline_mode=pl.Buffered(1))
    except Exception:                       # older API without pipeline_mode
        return pl.BlockSpec(shape, idx)


def _compiler_params(block_bytes, n_grid=1):
    vmem = int(min(max(2 * int(block_bytes) + (2 << 20), 32 << 20), 56 << 20))
    return pltpu.CompilerParams(
        dimension_semantics=("parallel",) * n_grid,
        vmem_limit_bytes=vmem)


# --------------------------------------------------------------------------
# Generic fused MLP kernel: chain of (Linear -> activation)
#   bf16 matmul operands, f32 accumulation, final output padded to 128 lanes
# --------------------------------------------------------------------------
def _mlp_kernel(x_ref, *refs, acts):
    o_ref = refs[-1]
    wb = refs[:-1]
    h = x_ref[...]
    for i, act in enumerate(acts):
        w = wb[2 * i][...]                        # bf16
        b = wb[2 * i + 1][...]                    # f32
        h = jnp.dot(h.astype(jnp.bfloat16), w,
                    preferred_element_type=jnp.float32) + b
        if act == "relu":
            h = jnp.maximum(h, 0.0)
        elif act == "sigmoid":
            h = jax.nn.sigmoid(h)
    o_ref[...] = h.astype(o_ref.dtype)


def mlp_pallas(x, layers, acts, tile_target=512):
    """x: [M, Din]; layers: [(w [din,dout], b [1,dout]), ...]; acts per layer."""
    M, Din = x.shape
    tm, Mp = _row_tile(M, tile_target)
    if Mp != M:
        x = jnp.pad(x, ((0, Mp - M), (0, 0)))
    Dout = layers[-1][0].shape[1]
    Dout_p = _round_up(Dout, _LANE)

    in_specs = [pl.BlockSpec((tm, Din), lambda i: (i, 0))]
    args = [x]
    wbytes = 0
    n_layers = len(layers)
    for li, (w, b) in enumerate(layers):
        if li == n_layers - 1 and Dout_p != Dout:
            w = jnp.pad(w, ((0, 0), (0, Dout_p - Dout)))
            b = jnp.pad(b, ((0, 0), (0, Dout_p - Dout)))
        wq = w.astype(jnp.bfloat16)
        in_specs += [_const_spec(wq.shape), _const_spec(b.shape)]
        args += [wq, b]
        wbytes += wq.size * 2 + b.size * 4

    blk = 2 * tm * (Din + Dout_p) * 4 + wbytes
    out = pl.pallas_call(
        functools.partial(_mlp_kernel, acts=tuple(acts)),
        grid=(Mp // tm,),
        in_specs=in_specs,
        out_specs=pl.BlockSpec((tm, Dout_p), lambda i: (i, 0)),
        out_shape=jax.ShapeDtypeStruct((Mp, Dout_p), jnp.float32),
        compiler_params=_compiler_params(blk),
    )(*args)
    return out[:M, :Dout]


# --------------------------------------------------------------------------
# Fused tokenizer MLP -> softmax -> codebook -> MAE mix -> chem heads.
# Every matmul is 128-aligned in K and N; single lane-dense output slab:
#   [ sampled (D_pad) | probs (V_p) | heads (128: col0=hbond, col1=hphob) ]
# --------------------------------------------------------------------------
def _token_heads_kernel(x_ref, tw1, tb1, tw2, tb2, cb, hw1, hb1, hw2, hb2,
                        out_ref, *, tau, d_col):
    x = x_ref[...]                                     # (tm, D_pad); col d_col = MAE mask
    xb = x.astype(jnp.bfloat16)
    h = jnp.maximum(jnp.dot(xb, tw1[...],
                            preferred_element_type=jnp.float32) + tb1[...], 0.0)
    logits = jnp.dot(h.astype(jnp.bfloat16), tw2[...],
                     preferred_element_type=jnp.float32) + tb2[...]
    probs = jax.nn.softmax(logits, axis=-1)            # padded lanes get ~0 mass (-1e9 bias)
    # TODO(synk): Gumbel noise of F.gumbel_softmax omitted for determinism
    #             (deterministic softmax(logits / tau) is used instead).
    p_tau = jax.nn.softmax(logits * (1.0 / tau), axis=-1)
    samp = jnp.dot(p_tau.astype(jnp.bfloat16), cb[...],
                   preferred_element_type=jnp.float32)  # (tm, D_pad), pad cols = 0
    m = x[:, d_col:d_col + 1]                           # (tm, 1) 1.0 = MAE-masked
    sampled = m * samp + (1.0 - m) * x                  # (tm, D_pad)
    sb = sampled.astype(jnp.bfloat16)
    hh = jnp.maximum(jnp.dot(sb, hw1[...],
                             preferred_element_type=jnp.float32) + hb1[...], 0.0)
    heads = jnp.dot(hh.astype(jnp.bfloat16), hw2[...],
                    preferred_element_type=jnp.float32) + hb2[...]
    out_ref[...] = jnp.concatenate([sampled, probs, heads], axis=-1)


def token_heads_pallas(params, pf, mae_mask_f, tau=1.0):
    M, D = pf.shape
    V = params["codebook"].shape[0]
    D_pad = _round_up(D + 1, _LANE)          # pf columns + one mask column
    Th = _round_up(D, _LANE)                 # tokenizer hidden
    V_p = _round_up(V, _LANE)                # vocab
    H2 = _round_up(2 * D, _LANE)             # fused hbond|hphob hidden
    tm, Mp = _row_tile(M, 512)

    # pack pf + MAE mask into one lane-dense input slab
    x = jnp.zeros((Mp, D_pad), jnp.float32)
    x = x.at[:M, :D].set(pf).at[:M, D].set(mae_mask_f.reshape(-1))

    (tw1, tb1), (tw2, tb2) = params["tokenizer"]
    (hbw1, hbb1), (hbw2, hbb2) = params["hbond"]
    (hpw1, hpb1), (hpw2, hpb2) = params["hphob"]
    cbw = params["codebook"]

    tw1p = jnp.zeros((D_pad, Th), jnp.float32).at[:D, :D].set(tw1)
    tb1p = jnp.zeros((1, Th), jnp.float32).at[:, :D].set(tb1)
    tw2p = jnp.zeros((Th, V_p), jnp.float32).at[:D, :V].set(tw2)
    tb2p = jnp.full((1, V_p), -1e9, jnp.float32).at[:, :V].set(tb2)
    cbp = jnp.zeros((V_p, D_pad), jnp.float32).at[:V, :D].set(cbw)
    hw1p = (jnp.zeros((D_pad, H2), jnp.float32)
            .at[:D, :D].set(hbw1).at[:D, D:2 * D].set(hpw1))
    hb1p = (jnp.zeros((1, H2), jnp.float32)
            .at[:, :D].set(hbb1).at[:, D:2 * D].set(hpb1))
    hw2p = (jnp.zeros((H2, _LANE), jnp.float32)
            .at[:D, 0].set(hbw2[:, 0]).at[D:2 * D, 1].set(hpw2[:, 0]))
    hb2p = (jnp.zeros((1, _LANE), jnp.float32)
            .at[0, 0].set(hbb2[0, 0]).at[0, 1].set(hpb2[0, 0]))

    bf = lambda a: a.astype(jnp.bfloat16)
    w_args = [bf(tw1p), tb1p, bf(tw2p), tb2p, bf(cbp), bf(hw1p), hb1p, bf(hw2p), hb2p]
    W = D_pad + V_p + _LANE
    wbytes = sum(int(a.size) * a.dtype.itemsize for a in w_args)
    blk = 2 * tm * (D_pad + W) * 4 + wbytes

    out = pl.pallas_call(
        functools.partial(_token_heads_kernel, tau=float(tau), d_col=D),
        grid=(Mp // tm,),
        in_specs=[pl.BlockSpec((tm, D_pad), lambda i: (i, 0))] +
                 [_const_spec(a.shape) for a in w_args],
        out_specs=pl.BlockSpec((tm, W), lambda i: (i, 0)),
        out_shape=jax.ShapeDtypeStruct((Mp, W), jnp.float32),
        compiler_params=_compiler_params(blk),
    )(x, *w_args)
    sampled = out[:M, :D]
    probs = out[:M, D_pad:D_pad + V]
    heads = out[:M, D_pad + V_p:D_pad + V_p + 2]
    return sampled, probs, heads


# --------------------------------------------------------------------------
# FoldingNet final_conv:
#   (1x1 conv -> BN(train batch stats) -> ReLU) x2 -> 1x1 conv -> + center
# Row-tiled 3-pass pipeline (two BN-stat passes + one normalize/matmul pass).
# The (D+5)-wide replicated feature is never materialized in HBM; the
# per-point feature stays 3-D (tile_p, nf, dff) in VMEM.
# --------------------------------------------------------------------------
def _fold_h1(pf_ref, ctr_ref, seedb_ref, w1pf_ref, w1ctr_ref):
    pf_part = jnp.dot(pf_ref[...].astype(jnp.bfloat16), w1pf_ref[...],
                      preferred_element_type=jnp.float32)           # (P, dff)
    ctr = ctr_ref[...]                                              # (P, nf, 3) f32
    w1c = w1ctr_ref[...]                                            # (3, dff)  f32
    ctr_part = (ctr[:, :, 0:1] * w1c[0:1, :][None, :, :]
                + ctr[:, :, 1:2] * w1c[1:2, :][None, :, :]
                + ctr[:, :, 2:3] * w1c[2:3, :][None, :, :])         # (P, nf, dff)
    seedb = seedb_ref[...]                                          # (nf, dff), includes b1
    return pf_part[:, None, :] + seedb[None, :, :] + ctr_part       # (P, nf, dff)


def _valid_rows(tile_p, n_valid):
    rid = lax.broadcasted_iota(jnp.int32, (tile_p, 1, 1), 0) + pl.program_id(0) * tile_p
    return (rid < n_valid).astype(jnp.float32)


def _sums(h):
    s = jnp.sum(jnp.sum(h, axis=0), axis=0, keepdims=True)          # (1, dff)
    ss = jnp.sum(jnp.sum(h * h, axis=0), axis=0, keepdims=True)
    return jnp.concatenate([s[None], ss[None]], axis=1)             # (1, 2, dff)


def _fold_stats1_kernel(pf_ref, ctr_ref, seedb_ref, w1pf, w1ctr, part_ref,
                        *, tile_p, n_valid):
    h1 = _fold_h1(pf_ref, ctr_ref, seedb_ref, w1pf, w1ctr)
    part_ref[...] = _sums(h1 * _valid_rows(tile_p, n_valid))


def _fold_stats2_kernel(pf_ref, ctr_ref, seedb_ref, w1pf, w1ctr,
                        sc1, sh1, w2, b2, part_ref, *, tile_p, n_valid):
    h1 = _fold_h1(pf_ref, ctr_ref, seedb_ref, w1pf, w1ctr)
    a1 = jnp.maximum(h1 * sc1[...][None] + sh1[...][None], 0.0)
    h2 = lax.dot_general(a1.astype(jnp.bfloat16), w2[...],
                         (((2,), (0,)), ((), ())),
                         preferred_element_type=jnp.float32) + b2[...][None]
    part_ref[...] = _sums(h2 * _valid_rows(tile_p, n_valid))


def _fold_final_kernel(pf_ref, ctr_ref, seedb_ref, w1pf, w1ctr,
                       sc1, sh1, w2, b2, sc2, sh2, w3, b3, fine_ref,
                       *, n_pad_lanes):
    h1 = _fold_h1(pf_ref, ctr_ref, seedb_ref, w1pf, w1ctr)
    a1 = jnp.maximum(h1 * sc1[...][None] + sh1[...][None], 0.0)
    h2 = lax.dot_general(a1.astype(jnp.bfloat16), w2[...],
                         (((2,), (0,)), ((), ())),
                         preferred_element_type=jnp.float32) + b2[...][None]
    a2 = jnp.maximum(h2 * sc2[...][None] + sh2[...][None], 0.0)
    h3 = lax.dot_general(a2.astype(jnp.bfloat16), w3[...],
                         (((2,), (0,)), ((), ())),
                         preferred_element_type=jnp.float32) + b3[...][None]
    fine = h3 + ctr_ref[...]                                        # (P, nf, 3)
    flat = fine.reshape(fine.shape[0], -1)                          # (P, nf*3) lane-dense-ish
    if n_pad_lanes:
        flat = jnp.concatenate(
            [flat, jnp.zeros((flat.shape[0], n_pad_lanes), flat.dtype)], axis=-1)
    fine_ref[...] = flat


def foldingnet_final_conv(params, pf, center, nf):
    N, D = pf.shape                         # center: (N, nf, 3)
    rows = N * nf
    w1, b1 = params["fc_w1"], params["fc_b1"]
    dff = w1.shape[1]
    w1_pf, w1_seed, w1_ctr = w1[:D], w1[D:D + 2], w1[D + 2:D + 5]

    gs2 = params["folding_seed"].shape[1]
    nc = nf // gs2
    seed_nf = jnp.tile(params["folding_seed"].T, (nc, 1))           # (nf, 2)
    seed_bias = seed_nf @ w1_seed + b1                              # (nf, dff), folds in b1

    # keep each (tile_p, nf, dff) f32 intermediate at ~<=4 MiB
    t_target = max(8, min(512, (4 << 20) // max(nf * dff * 4, 1)))
    tile_p, Np = _row_tile(N, t_target)
    if Np != N:
        pf = jnp.pad(pf, ((0, Np - N), (0, 0)))
        center = jnp.pad(center, ((0, Np - N), (0, 0), (0, 0)))
    grid = Np // tile_p
    eps = 1e-5

    w1pf_b = w1_pf.astype(jnp.bfloat16)
    w2_b = params["fc_w2"].astype(jnp.bfloat16)
    w3_b = params["fc_w3"].astype(jnp.bfloat16)

    F = nf * 3
    Fp = _round_up(F, _LANE)

    common_args = (pf, center, seed_bias, w1pf_b, w1_ctr)
    common_specs = [pl.BlockSpec((tile_p, D), lambda i: (i, 0)),
                    pl.BlockSpec((tile_p, nf, 3), lambda i: (i, 0, 0)),
                    _const_spec((nf, dff)),
                    _const_spec((D, dff)),
                    _const_spec((3, dff))]
    vec_spec = _const_spec((1, dff))
    part_spec = pl.BlockSpec((1, 2, dff), lambda i: (i, 0, 0))
    part_shape = jax.ShapeDtypeStruct((grid, 2, dff), jnp.float32)

    blk = (2 * tile_p * D * 4
           + 2 * tile_p * _round_up(nf, 8) * _LANE * 4      # padded ctr VMEM block
           + 2 * tile_p * Fp * 4
           + (nf + D + 3 + 6) * dff * 4 + dff * dff * 2 + dff * 3 * 2
           + 3 * tile_p * nf * dff * 4)                      # live intermediates
    cp = _compiler_params(blk)

    def bn_affine(partials, gamma, beta):
        mean = partials[:, 0, :].sum(0) / rows
        var = jnp.maximum(partials[:, 1, :].sum(0) / rows - mean ** 2, 0.0)
        scale = gamma.reshape(-1) * lax.rsqrt(var + eps)
        shift = beta.reshape(-1) - mean * scale
        return scale.reshape(1, dff), shift.reshape(1, dff)

    # pass 1: global batch stats of conv1 output
    part1 = pl.pallas_call(
        functools.partial(_fold_stats1_kernel, tile_p=tile_p, n_valid=N),
        grid=(grid,), in_specs=list(common_specs),
        out_specs=part_spec, out_shape=part_shape,
        compiler_params=cp)(*common_args)
    sc1, sh1 = bn_affine(part1, params["fc_g1"], params["fc_be1"])

    # pass 2: global batch stats of conv2 output (given BN1 affine)
    part2 = pl.pallas_call(
        functools.partial(_fold_stats2_kernel, tile_p=tile_p, n_valid=N),
        grid=(grid,),
        in_specs=list(common_specs) + [vec_spec, vec_spec,
                                       _const_spec((dff, dff)), vec_spec],
        out_specs=part_spec, out_shape=part_shape,
        compiler_params=cp)(*common_args, sc1, sh1, w2_b, params["fc_b2"])
    sc2, sh2 = bn_affine(part2, params["fc_g2"], params["fc_be2"])

    # pass 3: full chain + center add; lane-dense (tile_p, Fp) store
    fine_pad = pl.pallas_call(
        functools.partial(_fold_final_kernel, n_pad_lanes=Fp - F),
        grid=(grid,),
        in_specs=list(common_specs) + [vec_spec, vec_spec,
                                       _const_spec((dff, dff)), vec_spec,
                                       vec_spec, vec_spec,
                                       _const_spec((dff, 3)), _const_spec((1, 3))],
        out_specs=pl.BlockSpec((tile_p, Fp), lambda i: (i, 0)),
        out_shape=jax.ShapeDtypeStruct((Np, Fp), jnp.float32),
        compiler_params=cp)(*common_args, sc1, sh1, w2_b, params["fc_b2"],
                            sc2, sh2, w3_b, params["fc_b3"])
    return fine_pad[:N, :F]                                  # (N, nf*3)


def foldingnet_forward(params, feat_decoder, gs=2):
    B, G, D = feat_decoder.shape
    N = B * G
    pf = feat_decoder.reshape(N, D)
    gs2 = gs * gs
    nc = params["xyz_mlp"][-1][0].shape[1] // 3
    nf = nc * gs2

    coarse = mlp_pallas(pf, params["xyz_mlp"], ("relu", "relu", "none")).reshape(N, nc, 3)
    # per-fine-point center (tiny, plain XLA); also feeds the final "+ center"
    center = jnp.repeat(coarse, gs2, axis=1)                 # (N, nf, 3)
    fine_flat = foldingnet_final_conv(params, pf, center, nf)
    fine = fine_flat.reshape(B, G, nf, 3)
    return coarse.reshape(B, G, nc, 3), fine


# --------------------------------------------------------------------------
# Chamfer distance (L2): ||a||^2 + ||b||^2 - 2 a.b, gridded over the patch axis
# --------------------------------------------------------------------------
def _chamfer_kernel(x1_ref, x2_ref, d1_ref, d2_ref):
    a = x1_ref[...]                               # (tM, N1, 3)
    b = x2_ref[...]                               # (tM, N2, 3)
    a2 = jnp.sum(a * a, axis=-1)                  # (tM, N1)
    b2 = jnp.sum(b * b, axis=-1)                  # (tM, N2)
    cross = jnp.einsum('mik,mjk->mij', a, b,
                       preferred_element_type=jnp.float32)    # (tM, N1, N2)
    d = jnp.maximum(a2[:, :, None] + b2[:, None, :] - 2.0 * cross, 0.0)
    d1_ref[...] = jnp.min(d, axis=2)
    d2_ref[...] = jnp.min(d, axis=1)


def chamfer_l2(xyz1, xyz2):
    M, N1, _ = xyz1.shape
    N2 = xyz2.shape[1]
    if M == 0:
        return jnp.float32(0.0)
    # keep the (tM, N1, N2) distance cube <= ~2 MiB; pad M, never grid=1 blowup
    t_target = max(8, min(512, (2 << 20) // max(N1 * N2 * 4, 1)))
    tM, Mp = _row_tile(M, t_target)
    a, b = xyz1, xyz2
    if Mp != M:
        a = jnp.pad(a, ((0, Mp - M), (0, 0), (0, 0)))
        b = jnp.pad(b, ((0, Mp - M), (0, 0), (0, 0)))
    blk = 2 * tM * (N1 + N2) * (3 + 1) * 4 + tM * N1 * N2 * 4
    d1, d2 = pl.pallas_call(
        _chamfer_kernel, grid=(Mp // tM,),
        in_specs=[pl.BlockSpec((tM, N1, 3), lambda i: (i, 0, 0)),
                  pl.BlockSpec((tM, N2, 3), lambda i: (i, 0, 0))],
        out_specs=(pl.BlockSpec((tM, N1), lambda i: (i, 0)),
                   pl.BlockSpec((tM, N2), lambda i: (i, 0))),
        out_shape=(jax.ShapeDtypeStruct((Mp, N1), jnp.float32),
                   jax.ShapeDtypeStruct((Mp, N2), jnp.float32)),
        compiler_params=_compiler_params(blk),
    )(a, b)
    return jnp.mean(d1[:M]) + jnp.mean(d2[:M])


# --------------------------------------------------------------------------
# Parameters (deterministic init; mirrors module __init__ shapes)
# --------------------------------------------------------------------------
def init_params(key, D, vocab, n_pts_per_patch, d_ff_fold=128, gs=2):
    nc = n_pts_per_patch // (gs * gs)
    keys = iter(jax.random.split(key, 64))

    def lin(din, dout):
        w = jax.random.normal(next(keys), (din, dout), jnp.float32) / np.sqrt(din)
        b = jnp.zeros((1, dout), jnp.float32)
        return (w, b)

    p = {}
    p["tokenizer"] = [lin(D, D), lin(D, vocab)]
    p["codebook"] = jax.random.normal(next(keys), (vocab, D), jnp.float32)
    p["hbond"] = [lin(D, D), lin(D, 1)]
    p["hphob"] = [lin(D, D), lin(D, 1)]
    p["classifier"] = [lin(D, D // 2), lin(D // 2, D // 2), lin(D // 2, 1)]
    # FoldingNet
    p["xyz_mlp"] = [lin(D, d_ff_fold), lin(d_ff_fold, d_ff_fold), lin(d_ff_fold, 3 * nc)]
    cin = D + 5
    p["fc_w1"], p["fc_b1"] = lin(cin, d_ff_fold)
    p["fc_g1"] = jnp.ones((1, d_ff_fold), jnp.float32)
    p["fc_be1"] = jnp.zeros((1, d_ff_fold), jnp.float32)
    p["fc_w2"], p["fc_b2"] = lin(d_ff_fold, d_ff_fold)
    p["fc_g2"] = jnp.ones((1, d_ff_fold), jnp.float32)
    p["fc_be2"] = jnp.zeros((1, d_ff_fold), jnp.float32)
    p["fc_w3"], p["fc_b3"] = lin(d_ff_fold, 3)
    # folding seed: cat([a, b]) of linspace grid in [-0.05, 0.05]
    lin_sp = np.linspace(-0.05, 0.05, gs, dtype=np.float32)
    a = np.tile(lin_sp[None, :], (gs, 1)).reshape(-1)
    b = np.tile(lin_sp[:, None], (1, gs)).reshape(-1)
    p["folding_seed"] = jnp.asarray(np.stack([a, b], axis=0))     # (2, gs*gs)
    return p


# --------------------------------------------------------------------------
# SurfaceTransformerV2.dvae_forward equivalent (pretraining path)
# --------------------------------------------------------------------------
def surfformer_v2_dvae_forward(params, patch_feat, patch_xyz, grouped_xyz_norm,
                               patch_mask_np, patch_mae_mask_np,
                               hbond_soft, hphob_soft, temperature=1.0):
    # TODO(synk): dMaSIF surface encoder, fps, to_dense_batch and kNN grouping (point_forward)
    #             are external graph/point-cloud ops; their outputs are taken as inputs here.
    B, G, D = patch_feat.shape
    S = grouped_xyz_norm.shape[2]
    V = params["codebook"].shape[0]
    pf = patch_feat.reshape(B * G, D)

    # TODO(synk): random multinomial MAE masking replaced by a deterministic caller-supplied mask.
    mae_mask_f = jnp.asarray(np.asarray(patch_mae_mask_np), jnp.float32).reshape(B * G)

    # fused: tokenizer MLP -> softmax -> codebook lookup -> MAE mix -> hbond/hphob heads
    sampled, probs, heads = token_heads_pallas(params, pf, mae_mask_f, tau=temperature)

    # TODO(synk): patch_forward (dropout + cross-attention Encoder blocks with cdist rel_pos)
    #             is not defined in the provided source; identity pass-through used.
    feat_decoder = sampled.reshape(B, G, D)

    coarse, fine = foldingnet_forward(params, feat_decoder)
    whole_fine = lax.stop_gradient(fine + patch_xyz[:, :, None, :])

    midx = np.nonzero(np.asarray(patch_mae_mask_np).reshape(-1))[0]
    nc = coarse.shape[2]
    coarse_m = coarse.reshape(B * G, nc, 3)[midx]
    fine_m = fine.reshape(B * G, -1, 3)[midx]
    grouped_m = grouped_xyz_norm.reshape(B * G, S, 3)[midx]
    loss_recon = chamfer_l2(coarse_m, grouped_m) + chamfer_l2(fine_m, grouped_m)

    # KL(log_uniform || log_qy), batchmean, log_target=True
    mean_softmax = probs.reshape(B, G, V).mean(axis=1)
    log_qy = jnp.log(jnp.clip(mean_softmax, 1e-12, None))
    loss_klv = jnp.sum((1.0 / V) * (jnp.log(1.0 / V) - log_qy)) / B

    hbond_pred = heads[:, 0:1]
    hphob_pred = heads[:, 1:2]
    loss_hbond = jnp.mean((hbond_pred[midx] - hbond_soft.reshape(B * G, 1)[midx]) ** 2)
    loss_hphob = jnp.mean((hphob_pred[midx] - hphob_soft.reshape(B * G, 1)[midx]) ** 2)

    loss_dict = {"recon": loss_recon, "klv": loss_klv,
                 "hbond": loss_hbond, "hphobicity": loss_hphob}
    out_dict = {"fine": whole_fine, "mask": jnp.asarray(np.asarray(patch_mask_np))}
    return loss_dict, out_dict


# --------------------------------------------------------------------------
# SurfaceTransformerV2.forward classifier tail (partner path)
# --------------------------------------------------------------------------
def surfformer_v2_epitope_head(params, patch_feat_receptor, patch_mask_np, label_coarse):
    # TODO(synk): dMaSIF + cross-attention Encoder blocks preceding the classifier in forward()
    #             are external modules; only the classifier head + BCE loss are reproduced.
    B, G, D = patch_feat_receptor.shape
    pred = mlp_pallas(patch_feat_receptor.reshape(B * G, D), params["classifier"],
                      ("relu", "relu", "sigmoid"))[:, 0]
    idx = np.nonzero(np.asarray(patch_mask_np).reshape(-1))[0]
    p = jnp.clip(pred[idx], 1e-7, 1.0 - 1e-7)
    y = label_coarse.reshape(-1)[idx]
    loss_ep = -jnp.mean(y * jnp.log(p) + (1.0 - y) * jnp.log1p(-p))
    return {"ep": loss_ep}, {"ep_pred_coarse": pred[idx], "ep_true_coarse": y}


# --------------------------------------------------------------------------
if __name__ == "__main__":
    B, G, S, D, V = 2, 8, 16, 32, 64       # batch, n_patches, n_pts_per_patch, hidden, vocab
    key = jax.random.PRNGKey(0)
    k1, k2, k3, k4, k5, k6, kp = jax.random.split(key, 7)

    patch_feat = jax.random.normal(k1, (B, G, D), jnp.float32)
    patch_xyz = jax.random.normal(k2, (B, G, 3), jnp.float32)
    grouped_xyz_norm = 0.1 * jax.random.normal(k3, (B, G, S, 3), jnp.float32)
    hbond_soft = jax.random.uniform(k4, (B, G, 1), jnp.float32)
    hphob_soft = jax.random.uniform(k5, (B, G, 1), jnp.float32)
    intf_label = (jax.random.uniform(k6, (B, G)) > 0.5).astype(jnp.float32)

    patch_mask = np.ones((B, G), dtype=bool)
    patch_mae_mask = np.zeros((B, G), dtype=bool)
    patch_mae_mask[:, : G // 2] = True      # deterministic 0.5 mask ratio

    params = init_params(kp, D, V, S, d_ff_fold=128, gs=2)

    loss_dict, out_dict = surfformer_v2_dvae_forward(
        params, patch_feat, patch_xyz, grouped_xyz_norm,
        patch_mask, patch_mae_mask, hbond_soft, hphob_soft, temperature=1.0)

    ep_loss_dict, ep_out_dict = surfformer_v2_epitope_head(
        params, patch_feat, patch_mask, intf_label)

    jax.block_until_ready((loss_dict, out_dict, ep_loss_dict, ep_out_dict))
    print("KERNEL_OK")
</pallas_src>

<mosaic_0001>
module attributes {stable_mosaic.version = 11 : i64} {
  func.func @_token_heads_kernel(%arg0: i32, %arg1: memref<8x128xf32, #tpu.memory_space<vmem>>, %arg2: memref<128x128xbf16, #tpu.memory_space<vmem>>, %arg3: memref<1x128xf32, #tpu.memory_space<vmem>>, %arg4: memref<128x128xbf16, #tpu.memory_space<vmem>>, %arg5: memref<1x128xf32, #tpu.memory_space<vmem>>, %arg6: memref<128x128xbf16, #tpu.memory_space<vmem>>, %arg7: memref<128x128xbf16, #tpu.memory_space<vmem>>, %arg8: memref<1x128xf32, #tpu.memory_space<vmem>>, %arg9: memref<128x128xbf16, #tpu.memory_space<vmem>>, %arg10: memref<1x128xf32, #tpu.memory_space<vmem>>, %arg11: memref<8x384xf32, #tpu.memory_space<vmem>>) attributes {dimension_semantics = [#tpu.dimension_semantics<parallel>], iteration_bounds = array<i64: 2>, scalar_prefetch = 0 : i64, scratch_operands = 0 : i64, tpu.core_type = #tpu.core_type<tc>, window_params = [{transform_indices = @transform_0, window_bounds = array<i64: 8, 128>}, {pipeline_mode = #tpu.pipeline_mode<synchronous>, transform_indices = @transform_1, window_bounds = array<i64: 128, 128>}, {pipeline_mode = #tpu.pipeline_mode<synchronous>, transform_indices = @transform_2, window_bounds = array<i64: 1, 128>}, {pipeline_mode = #tpu.pipeline_mode<synchronous>, transform_indices = @transform_3, window_bounds = array<i64: 128, 128>}, {pipeline_mode = #tpu.pipeline_mode<synchronous>, transform_indices = @transform_4, window_bounds = array<i64: 1, 128>}, {pipeline_mode = #tpu.pipeline_mode<synchronous>, transform_indices = @transform_5, window_bounds = array<i64: 128, 128>}, {pipeline_mode = #tpu.pipeline_mode<synchronous>, transform_indices = @transform_6, window_bounds = array<i64: 128, 128>}, {pipeline_mode = #tpu.pipeline_mode<synchronous>, transform_indices = @transform_7, window_bounds = array<i64: 1, 128>}, {pipeline_mode = #tpu.pipeline_mode<synchronous>, transform_indices = @transform_8, window_bounds = array<i64: 128, 128>}, {pipeline_mode = #tpu.pipeline_mode<synchronous>, transform_indices = @transform_9, window_bounds = array<i64: 1, 128>}, {transform_indices = @transform_10, window_bounds = array<i64: 8, 384>}]} {
    %c0 = arith.constant 0 : index
    %c0_0 = arith.constant 0 : index
    %0 = vector.load %arg1[%c0, %c0_0] : memref<8x128xf32, #tpu.memory_space<vmem>>, vector<8x128xf32>
    %1 = arith.truncf %0 : vector<8x128xf32> to vector<8x128xbf16>
    %c0_1 = arith.constant 0 : index
    %c0_2 = arith.constant 0 : index
    %2 = vector.load %arg2[%c0_1, %c0_2] : memref<128x128xbf16, #tpu.memory_space<vmem>>, vector<128x128xbf16>
    %cst = arith.constant dense<0.000000e+00> : vector<8x128xf32>
    %3 = tpu.matmul %1, %2, %cst {dimension_numbers = #tpu.dot_dimension_numbers<[1], [0], [0], [1], [0, 0, 1, 1], [], []>} : vector<8x128xbf16>, vector<128x128xbf16>, vector<8x128xf32> -> vector<8x128xf32>
    %c0_3 = arith.constant 0 : index
    %c0_4 = arith.constant 0 : index
    %4 = vector.load %arg3[%c0_3, %c0_4] : memref<1x128xf32, #tpu.memory_space<vmem>>, vector<1x128xf32>
    %5 = vector.broadcast %4 : vector<1x128xf32> to vector<8x128xf32>
    %6 = arith.addf %3, %5 : vector<8x128xf32>
    %cst_5 = arith.constant 0.000000e+00 : f32
    %7 = vector.broadcast %cst_5 : f32 to vector<8x128xf32>
    %8 = arith.maximumf %6, %7 : vector<8x128xf32>
    %9 = arith.truncf %8 : vector<8x128xf32> to vector<8x128xbf16>
    %c0_6 = arith.constant 0 : index
    %c0_7 = arith.constant 0 : index
    %10 = vector.load %arg4[%c0_6, %c0_7] : memref<128x128xbf16, #tpu.memory_space<vmem>>, vector<128x128xbf16>
    %cst_8 = arith.constant dense<0.000000e+00> : vector<8x128xf32>
    %11 = tpu.matmul %9, %10, %cst_8 {dimension_numbers = #tpu.dot_dimension_numbers<[1], [0], [0], [1], [0, 0, 1, 1], [], []>} : vector<8x128xbf16>, vector<128x128xbf16>, vector<8x128xf32> -> vector<8x128xf32>
    %c0_9 = arith.constant 0 : index
    %c0_10 = arith.constant 0 : index
    %12 = vector.load %arg5[%c0_9, %c0_10] : memref<1x128xf32, #tpu.memory_space<vmem>>, vector<1x128xf32>
    %13 = vector.broadcast %12 : vector<1x128xf32> to vector<8x128xf32>
    %14 = arith.addf %11, %13 : vector<8x128xf32>
    %cst_11 = arith.constant dense<0xFF800000> : vector<8xf32>
    %15 = vector.multi_reduction <maximumf>, %14, %cst_11 [1] : vector<8x128xf32> to vector<8xf32>
    %cst_12 = arith.constant 0xFF800000 : f32
    %16 = vector.broadcast %cst_12 : f32 to vector<8xf32>
    %17 = arith.maximumf %16, %15 : vector<8xf32>
    %18 = vector.shape_cast %17 : vector<8xf32> to vector<8x1xf32>
    %19 = vector.broadcast %18 : vector<8x1xf32> to vector<8x128xf32>
    %20 = arith.subf %14, %19 : vector<8x128xf32>
    %21 = math.exp %20 : vector<8x128xf32>
    %cst_13 = arith.constant dense<0.000000e+00> : vector<8xf32>
    %22 = vector.multi_reduction <add>, %21, %cst_13 [1] : vector<8x128xf32> to vector<8xf32>
    %23 = vector.shape_cast %22 : vector<8xf32> to vector<8x1xf32>
    %24 = vector.broadcast %23 : vector<8x1xf32> to vector<8x128xf32>
    %25 = arith.divf %21, %24 : vector<8x128xf32>
    %cst_14 = arith.constant 1.000000e+00 : f32
    %26 = vector.broadcast %cst_14 : f32 to vector<8x128xf32>
    %27 = arith.mulf %14, %26 : vector<8x128xf32>
    %cst_15 = arith.constant dense<0xFF800000> : vector<8xf32>
    %28 = vector.multi_reduction <maximumf>, %27, %cst_15 [1] : vector<8x128xf32> to vector<8xf32>
    %cst_16 = arith.constant 0xFF800000 : f32
    %29 = vector.broadcast %cst_16 : f32 to vector<8xf32>
    %30 = arith.maximumf %29, %28 : vector<8xf32>
    %31 = vector.shape_cast %30 : vector<8xf32> to vector<8x1xf32>
    %32 = vector.broadcast %31 : vector<8x1xf32> to vector<8x128xf32>
    %33 = arith.subf %27, %32 : vector<8x128xf32>
    %34 = math.exp %33 : vector<8x128xf32>
    %cst_17 = arith.constant dense<0.000000e+00> : vector<8xf32>
    %35 = vector.multi_reduction <add>, %34, %cst_17 [1] : vector<8x128xf32> to vector<8xf32>
    %36 = vector.shape_cast %35 : vector<8xf32> to vector<8x1xf32>
    %37 = vector.broadcast %36 : vector<8x1xf32> to vector<8x128xf32>
    %38 = arith.divf %34, %37 : vector<8x128xf32>
    %39 = arith.truncf %38 : vector<8x128xf32> to vector<8x128xbf16>
    %c0_18 = arith.constant 0 : index
    %c0_19 = arith.constant 0 : index
    %40 = vector.load %arg6[%c0_18, %c0_19] : memref<128x128xbf16, #tpu.memory_space<vmem>>, vector<128x128xbf16>
    %cst_20 = arith.constant dense<0.000000e+00> : vector<8x128xf32>
    %41 = tpu.matmul %39, %40, %cst_20 {dimension_numbers = #tpu.dot_dimension_numbers<[1], [0], [0], [1], [0, 0, 1, 1], [], []>} : vector<8x128xbf16>, vector<128x128xbf16>, vector<8x128xf32> -> vector<8x128xf32>
    %42 = vector.extract_strided_slice %0 {offsets = [0, 32], sizes = [8, 1], strides = [1, 1]} : vector<8x128xf32> to vector<8x1xf32>
    %43 = vector.broadcast %42 : vector<8x1xf32> to vector<8x128xf32>
    %44 = arith.mulf %43, %41 : vector<8x128xf32>
    %cst_21 = arith.constant 1.000000e+00 : f32
    %45 = vector.broadcast %cst_21 : f32 to vector<8x1xf32>
    %46 = arith.subf %45, %42 : vector<8x1xf32>
    %47 = vector.broadcast %46 : vector<8x1xf32> to vector<8x128xf32>
    %48 = arith.mulf %47, %0 : vector<8x128xf32>
    %49 = arith.addf %44, %48 : vector<8x128xf32>
    %50 = arith.truncf %49 : vector<8x128xf32> to vector<8x128xbf16>
    %c0_22 = arith.constant 0 : index
    %c0_23 = arith.constant 0 : index
    %51 = vector.load %arg7[%c0_22, %c0_23] : memref<128x128xbf16, #tpu.memory_space<vmem>>, vector<128x128xbf16>
    %cst_24 = arith.constant dense<0.000000e+00> : vector<8x128xf32>
    %52 = tpu.matmul %50, %51, %cst_24 {dimension_numbers = #tpu.dot_dimension_numbers<[1], [0], [0], [1], [0, 0, 1, 1], [], []>} : vector<8x128xbf16>, vector<128x128xbf16>, vector<8x128xf32> -> vector<8x128xf32>
    %c0_25 = arith.constant 0 : index
    %c0_26 = arith.constant 0 : index
    %53 = vector.load %arg8[%c0_25, %c0_26] : memref<1x128xf32, #tpu.memory_space<vmem>>, vector<1x128xf32>
    %54 = vector.broadcast %53 : vector<1x128xf32> to vector<8x128xf32>
    %55 = arith.addf %52, %54 : vector<8x128xf32>
    %cst_27 = arith.constant 0.000000e+00 : f32
    %56 = vector.broadcast %cst_27 : f32 to vector<8x128xf32>
    %57 = arith.maximumf %55, %56 : vector<8x128xf32>
    %58 = arith.truncf %57 : vector<8x128xf32> to vector<8x128xbf16>
    %c0_28 = arith.constant 0 : index
    %c0_29 = arith.constant 0 : index
    %59 = vector.load %arg9[%c0_28, %c0_29] : memref<128x128xbf16, #tpu.memory_space<vmem>>, vector<128x128xbf16>
    %cst_30 = arith.constant dense<0.000000e+00> : vector<8x128xf32>
    %60 = tpu.matmul %58, %59, %cst_30 {dimension_numbers = #tpu.dot_dimension_numbers<[1], [0], [0], [1], [0, 0, 1, 1], [], []>} : vector<8x128xbf16>, vector<128x128xbf16>, vector<8x128xf32> -> vector<8x128xf32>
    %c0_31 = arith.constant 0 : index
    %c0_32 = arith.constant 0 : index
    %61 = vector.load %arg10[%c0_31, %c0_32] : memref<1x128xf32, #tpu.memory_space<vmem>>, vector<1x128xf32>
    %62 = vector.broadcast %61 : vector<1x128xf32> to vector<8x128xf32>
    %63 = arith.addf %60, %62 : vector<8x128xf32>
    %64 = tpu.concatenate %49, %25, %63 in 1 : vector<8x128xf32>, vector<8x128xf32>, vector<8x128xf32> -> vector<8x384xf32>
    %c0_33 = arith.constant 0 : index
    %c0_34 = arith.constant 0 : index
    %65 = vector.load %arg11[%c0_33, %c0_34] : memref<8x384xf32, #tpu.memory_space<vmem>>, vector<8x384xf32>
    tpu.vector_store %arg11[%c0_33, %c0_34], %64 {strides = array<i32>} : memref<8x384xf32, #tpu.memory_space<vmem>>, vector<8x384xf32>,
    return
  }
  func.func @transform_0(%arg0: i32) -> (i32, i32) {
    %c0_i32 = arith.constant 0 : i32
    %c0_i32_0 = arith.constant 0 : i32
    return %arg0, %c0_i32 : i32, i32
  }
  func.func @transform_1(%arg0: i32) -> (i32, i32) {
    %c0_i32 = arith.constant 0 : i32
    %c0_i32_0 = arith.constant 0 : i32
    %c0_i32_1 = arith.constant 0 : i32
    return %c0_i32, %c0_i32_0 : i32, i32
  }
  func.func @transform_2(%arg0: i32) -> (i32, i32) {
    %c0_i32 = arith.constant 0 : i32
    %c0_i32_0 = arith.constant 0 : i32
    %c0_i32_1 = arith.constant 0 : i32
    return %c0_i32, %c0_i32_0 : i32, i32
  }
  func.func @transform_3(%arg0: i32) -> (i32, i32) {
    %c0_i32 = arith.constant 0 : i32
    %c0_i32_0 = arith.constant 0 : i32
    %c0_i32_1 = arith.constant 0 : i32
    return %c0_i32, %c0_i32_0 : i32, i32
  }
  func.func @transform_4(%arg0: i32) -> (i32, i32) {
    %c0_i32 = arith.constant 0 : i32
    %c0_i32_0 = arith.constant 0 : i32
    %c0_i32_1 = arith.constant 0 : i32
    return %c0_i32, %c0_i32_0 : i32, i32
  }
  func.func @transform_5(%arg0: i32) -> (i32, i32) {
    %c0_i32 = arith.constant 0 : i32
    %c0_i32_0 = arith.constant 0 : i32
    %c0_i32_1 = arith.constant 0 : i32
    return %c0_i32, %c0_i32_0 : i32, i32
  }
  func.func @transform_6(%arg0: i32) -> (i32, i32) {
    %c0_i32 = arith.constant 0 : i32
    %c0_i32_0 = arith.constant 0 : i32
    %c0_i32_1 = arith.constant 0 : i32
    return %c0_i32, %c0_i32_0 : i32, i32
  }
  func.func @transform_7(%arg0: i32) -> (i32, i32) {
    %c0_i32 = arith.constant 0 : i32
    %c0_i32_0 = arith.constant 0 : i32
    %c0_i32_1 = arith.constant 0 : i32
    return %c0_i32, %c0_i32_0 : i32, i32
  }
  func.func @transform_8(%arg0: i32) -> (i32, i32) {
    %c0_i32 = arith.constant 0 : i32
    %c0_i32_0 = arith.constant 0 : i32
    %c0_i32_1 = arith.constant 0 : i32
    return %c0_i32, %c0_i32_0 : i32, i32
  }
  func.func @transform_9(%arg0: i32) -> (i32, i32) {
    %c0_i32 = arith.constant 0 : i32
    %c0_i32_0 = arith.constant 0 : i32
    %c0_i32_1 = arith.constant 0 : i32
    return %c0_i32, %c0_i32_0 : i32, i32
  }
  func.func @transform_10(%arg0: i32) -> (i32, i32) {
    %c0_i32 = arith.constant 0 : i32
    %c0_i32_0 = arith.constant 0 : i32
    return %arg0, %c0_i32 : i32, i32
  }
}

</mosaic_0001>

<bundles_post_ra>
// kernel: tpu_custom_call.1
= control target key start
LH: loop header
LB: loop body
LE: loop exit
PB: predicated region body
PF: predicated region fallthrough
CT: control target
= control target key end

     0   :  { %s2140_s0 = inlined_call_operand.hbm [shape: f32[16,128], index: 0, kind: input, shape index: {}]   ;;  %s2141_s1 = inlined_call_operand.hbm [shape: bf16[128,128], index: 1, kind: input, shape index: {}]   ;;  %s2142_s2 = inlined_call_operand.vmem [shape: f32[1,128], index: 2, kind: input, shape index: {}]   ;;  %s2143_s3 = inlined_call_operand.hbm [shape: bf16[128,128], index: 3, kind: input, shape index: {}]   ;;  %s2144_s4 = inlined_call_operand.vmem [shape: f32[1,128], index: 4, kind: input, shape index: {}]   ;;  %s2145_s5 = inlined_call_operand.hbm [shape: bf16[128,128], index: 5, kind: input, shape index: {}]   ;;  %s2146_s6 = inlined_call_operand.hbm [shape: bf16[128,128], index: 6, kind: input, shape index: {}]   ;;  %s2147_s7 = inlined_call_operand.vmem [shape: f32[1,128], index: 7, kind: input, shape index: {}]   ;;  %s2148_s8 = inlined_call_operand.hbm [shape: bf16[128,128], index: 8, kind: input, shape index: {}]   ;;  %s2149_s9 = inlined_call_operand.vmem [shape: f32[1,128], index: 9, kind: input, shape index: {}]   ;;  %s2150_s10 = inlined_call_operand.hbm [shape: f32[16,384], index: 10, kind: output, shape index: {}]  }
   0x1   :  { %2155 = sst [smem:[#allocation19_spill]] %s2141_s1 }
   0x2   :  { %2156 = sst [smem:[#allocation20_spill]] %s2143_s3 }
   0x3   :  { %2157 = sst [smem:[#allocation21_spill]] %s2145_s5 }
   0x4   :  { %2158 = sst [smem:[#allocation22_spill]] %s2146_s6 }
   0x5   :  { %2159 = sst [smem:[#allocation23_spill]] %s2148_s8 }
   0x6   :  { %15 = vsyncpa [#allocation3], 0 }
   0x7   :  { %17 = vsyncpa [#allocation3 + $0x1], 0 }
   0x8   :  { %18 = vsyncpa [#allocation6], 0 }
   0x9   :  { %19 = vsyncpa [#allocation9], 0 }
   0xa   :  { %20 = vsyncpa [#allocation12], 0 }
   0xb   :  { %21 = vsyncpa [#allocation4], 0 }
   0xc   :  { %23 = vsyncpa [#allocation4 + $0x1], 0  ;;  %s1826_s13 = smov 0   ;;  %s1828_s14 = smov 0  }
   0xd   :  { %s1830_s15 = smov 0   ;;  %s1832_s16 = smov 0  }
   0xe LB: > { %s1759_s17 = smov [#allocation5]   ;;  %s1847_s19 = sadd.s32 4294967295, %s1757_s16   ;;  %s1757_s16 = sphi %s1832_s16, %s2186_s16   ;;  %s1753_s15 = sphi %s1830_s15, %s2185_s15   ;;  %s1749_s14 = sphi %s1828_s14, %s2184_s14   ;;  %s1745_s13 = sphi %s1826_s13, %s2183_s13  }
   0xf   : > { %s287_s18 = sshll.u32 %s1759_s17, 4  ;;  %p1165_p0 = scmp.ge.s32.totalorder %s1757_s16, 1  ;;  %s288_s18 = int_to_ptr.vmem [resolvable:$true] %s287_s18 }
  0x10   : > { %p2151_p1 = scmp.eq.s32.totalorder %s1847_s19, 0  ;;  %p275_p2 = scmp.lt.s32.totalorder %s1757_s16, 3 }
  0x11   : > { %s1760_s21 = smov [#allocation8]   ;;  %s1761_s24 = smov [#allocation7]  }
  0x12   : > { %p1852_p3 = pnand %p1165_p0, %p275_p2  ;;  %s319_s22 = sshll.u32 %s1760_s21, 4  ;;  %s1865_s22 = int_to_ptr.vmem [resolvable:$true] %s319_s22 }
  0x13   : > { %s303_s25 = sshll.u32 %s1761_s24, 4  ;;  %s1534_s27 = scalar_lea.vmem %s288_s18, 1024  ;;  %s1867_s25 = int_to_ptr.vmem [resolvable:$true] %s303_s25 }
  0x14   : > { %s2160_s20 = scalar_select %p1852_p3, 1, 0 }
  0x15   : > { %p1399_p5 = pneg %p1852_p3  ;;  %p1535_p8 = scmp.ne.s32.totalorder %s288_s18, %s1534_s27 }
  0x16   : > { %p1542_p11 = scmp.lt.s32.totalorder %s288_s18, %s288_s18  ;;  %p1543_p12 = scmp.lt.s32.totalorder %s1534_s27, %s1534_s27 }
  0x17   : > { %p1861_p6 = pnand %p1399_p5, %p2151_p1 }
  0x18   : > { %p1544_p13 = por %p1543_p12, %p1542_p11 }
  0x19   : > { %p1871_p7 = pneg %p1861_p6 }
  0x1b   : > { %p1537_p9 = pnand %p1535_p8, %p1871_p7 }
  0x1d   : > { %p1538_p10 = pneg %p1537_p9 }
  0x1f   : > { %p1545_p0 = pnand %p1544_p13, %p1538_p10 }
  0x21   : > { %1548 = shalt.err (!%p1545_p0)
}
  0x22   : > { %s1762_s28 = smov 64   ;;  %s1763_s29 = smov 4  }
  0x23   : > { %s2163_s1 = sld [smem:[#allocation19_spill]]  ;;  %s1560_s12 = scalar_lea.vmem %s1865_s22, 1024 }
  0x24   : > { %p1561_p2 = scmp.ne.s32.totalorder %s1865_s22, %s1560_s12  ;;  %p1568_p9 = scmp.lt.s32.totalorder %s1865_s22, %s1865_s22 }
  0x25   : > { %p1569_p10 = scmp.lt.s32.totalorder %s1560_s12, %s1560_s12 }
  0x26   : > { %p1563_p5 = pnand %p1561_p2, %p1871_p7 }
  0x27   : > { %p1570_p11 = por %p1569_p10, %p1568_p9 }
  0x28   : > { %p1564_p8 = pneg %p1563_p5 }
  0x29   : > { %1402 = dma.hbm_to_vmem [thread:$0]  (!%p1861_p6), %s2163_s1, 1024, %s288_s18, [#allocation6], %s1762_s28, %s1762_s28, %s1763_s29  }
  0x2a   : > { %p1571_p12 = pnand %p1570_p11, %p1564_p8 }
  0x2c   : > { %1574 = shalt.err (!%p1571_p12)
}
  0x2d   : > { %s2164_s5 = sld [smem:[#allocation21_spill]]  ;;  %s1586_s18 = scalar_lea.vmem %s1867_s25, 1024 }
  0x2e   : > { %p1587_p13 = scmp.ne.s32.totalorder %s1867_s25, %s1586_s18  ;;  %p1594_p5 = scmp.lt.s32.totalorder %s1867_s25, %s1867_s25 }
  0x2f   : > { %p1595_p8 = scmp.lt.s32.totalorder %s1586_s18, %s1586_s18 }
  0x30   : > { %p1589_p0 = pnand %p1587_p13, %p1871_p7 }
  0x31   : > { %p1596_p9 = por %p1595_p8, %p1594_p5 }
  0x32   : > { %p1590_p2 = pneg %p1589_p0 }
  0x33   : > { %1408 = dma.hbm_to_vmem [thread:$0]  (!%p1861_p6), %s2164_s5, 1024, %s1865_s22, [#allocation9], %s1762_s28, %s1762_s28, %s1763_s29  }
  0x34   : > { %p1597_p10 = pnand %p1596_p9, %p1590_p2 }
  0x36   : > { %1600 = shalt.err (!%p1597_p10)
}
  0x37   : > { %s2165_s3 = sld [smem:[#allocation20_spill]]  ;;  %s1764_s22 = smov [#allocation10]  }
  0x38   : > { %s332_s30 = sshll.u32 %s1764_s22, 4  ;;  %s1765_s11 = smov [#allocation11]   ;;  %s333_s30 = int_to_ptr.vmem [resolvable:$true] %s332_s30 }
  0x39   : > { %s348_s12 = sshll.u32 %s1765_s11, 4  ;;  %s1612_s17 = scalar_lea.vmem %s333_s30, 1024  ;;  %s349_s12 = int_to_ptr.vmem [resolvable:$true] %s348_s12 }
  0x3a   : > { %p1613_p11 = scmp.ne.s32.totalorder %s333_s30, %s1612_s17  ;;  %p1620_p0 = scmp.lt.s32.totalorder %s333_s30, %s333_s30 }
  0x3b   : > { %p1621_p2 = scmp.lt.s32.totalorder %s1612_s17, %s1612_s17 }
  0x3c   : > { %p1615_p12 = pnand %p1613_p11, %p1871_p7 }
  0x3d   : > { %1405 = dma.hbm_to_vmem [thread:$0]  (!%p1861_p6), %s2165_s3, 1024, %s1867_s25, [#allocation6], %s1762_s28, %s1762_s28, %s1763_s29  }
  0x3e   : > { %p1616_p13 = pneg %p1615_p12  ;;  %p1622_p5 = por %p1621_p2, %p1620_p0 }
  0x40   : > { %p1623_p8 = pnand %p1622_p5, %p1616_p13 }
  0x42   : > { %1626 = shalt.err (!%p1623_p8)
}
  0x43   : > { %s2166_s6 = sld [smem:[#allocation22_spill]]  ;;  %s1638_s18 = scalar_lea.vmem %s349_s12, 1024 }
  0x44   : > { %p1639_p9 = scmp.ne.s32.totalorder %s349_s12, %s1638_s18  ;;  %p1646_p12 = scmp.lt.s32.totalorder %s349_s12, %s349_s12 }
  0x45   : > { %p1647_p0 = scmp.lt.s32.totalorder %s1638_s18, %s1638_s18 }
  0x46   : > { %p1641_p10 = pnand %p1639_p9, %p1871_p7 }
  0x47   : > { %p1648_p13 = por %p1647_p0, %p1646_p12 }
  0x48   : > { %p1642_p11 = pneg %p1641_p10 }
  0x49   : > { %1411 = dma.hbm_to_vmem [thread:$0]  (!%p1861_p6), %s2166_s6, 1024, %s333_s30, [#allocation9], %s1762_s28, %s1762_s28, %s1763_s29  }
  0x4a   : > { %p1649_p2 = pnand %p1648_p13, %p1642_p11 }
  0x4c   : > { %1652 = shalt.err (!%p1649_p2)
}
  0x4d   : > { %s2167_s8 = sld [smem:[#allocation23_spill]]  ;;  %s1164_s23 = sadd.s32 4294967294, %s1757_s16  }
  0x4e   : > { %s1937_s26 = sadd.s32 1, %s1757_s16   ;;  %s36_s22 = sadd.s32 1, %s1753_s15 }
  0x4f   : > { %s33_s30 = ssub.s32 %s1757_s16, %s1937_s26  ;;  %p43_p7 = scmp.ne.s32.totalorder %s1753_s15, %s1749_s14 }
  0x50   : > { %p34_p5 = scmp.eq.s32.totalorder %s33_s30, 0  ;;  %p44_p8 = scmp.eq.s32.totalorder %s1757_s16, 0 }
  0x51   : > { %p49_p9 = scmp.ne.s32.totalorder %s1749_s14, %s1745_s13  ;;  %p262_p10 = scmp.eq.s32.totalorder %s1847_s19, 1 }
  0x52   : > { %s1949_s11 = scalar_select %p34_p5, %s1753_s15, %s36_s22  }
  0x53   : > { %1414 = dma.hbm_to_vmem [thread:$0]  (!%p1861_p6), %s2167_s8, 1024, %s349_s12, [#allocation12], %s1762_s28, %s1762_s28, %s1763_s29  }
  0x54   : > { %p45_p11 = por %p44_p8, %p43_p7  ;;  %p1953_p12 = por %p2151_p1, %p49_p9 }
  0x55   : > { %p1957_p6 = por %p262_p10, %p43_p7  ;;  %p268_p0 = scmp.eq.s32.totalorder %s1164_s23, 1 }
  0x56   : > { %s2168_s17 = scalar_select %p1953_p12, 1, 0 }
  0x57   : > { %s2169_s28 = scalar_select %p1957_p6, 1, 0 }
  0x58   : > { %p1428_p13 = scmp.lt.s32.totalorder %s1757_s16, 2  ;;  %s365_s29 = sand.u32 1, %s1753_s15  }
  0x59   : > { %p1963_p2 = por %p268_p0, %p49_p9  ;;  %s1172_s25 = sshll.u32 %s365_s29, 3 }
  0x5a   : > { %s1173_s21 = sshll.u32 %s1757_s16, 7  ;;  %s369_s22 = scalar_lea.vmem [#allocation2], %s1172_s25 }
  0x5b   : > { %s2170_s12 = scalar_select %p1963_p2, 1, 0 }
  0x5c   : > { %s1971_s27 = scalar_lea.hbm %s2140_s0, %s1173_s21  ;;  %s376_s30 = sshll.u32 %s369_s22, 4  ;;  %s377_s30 = int_to_ptr.vmem [resolvable:$true] %s376_s30 }
  0x5d   : > { %p1973_p7 = pnand %p1428_p13, %p45_p11  ;;  %s366_s1 = scalar_lea.sflag [#allocation3], %s365_s29 }
  0x5e   : > { %s1653_s3 = scalar_lea.hbm %s1971_s27, 128  ;;  %s1658_s24 = scalar_lea.hbm %s2140_s0, 256 }
  0x5f   : > { %p1654_p5 = scmp.ne.s32.totalorder %s1971_s27, %s1653_s3  ;;  %p1655_p8 = pneg %p1973_p7 }
  0x60   : > { %p1659_p11 = scmp.lt.s32.totalorder %s1971_s27, %s2140_s0  ;;  %p1660_p0 = scmp.lt.s32.totalorder %s1658_s24, %s1653_s3 }
  0x61   : > { %p1656_p9 = pnand %p1655_p8, %p1654_p5 }
  0x62   : > { %p1661_p13 = por %p1660_p0, %p1659_p11 }
  0x63   : > { %p1657_p10 = pneg %p1656_p9 }
  0x65   : > { %p1662_p4 = pnand %p1661_p13, %p1657_p10 }
  0x67   : > { %1665 = shalt.err (!%p1662_p4)
}
  0x68   : > { %s1666_s22 = scalar_lea.vmem %s377_s30, 128  ;;  %s1766_s29 = smov [#allocation2]  }
  0x69   : > { %p1667_p1 = scmp.ne.s32.totalorder %s377_s30, %s1666_s22  ;;  %s1671_s6 = sshll.u32 %s1766_s29, 4  ;;  %s1672_s6 = int_to_ptr.vmem [resolvable:$false] %s1671_s6 }
  0x6a   : > { %s1673_s8 = scalar_lea.vmem %s1672_s6, 256  ;;  %p1674_p5 = scmp.lt.s32.totalorder %s377_s30, %s1672_s6 }
  0x6b   : > { %p1669_p2 = pnand %p1667_p1, %p1655_p8  ;;  %p1675_p9 = scmp.lt.s32.totalorder %s1673_s8, %s1666_s22 }
  0x6d   : > { %p1670_p6 = pneg %p1669_p2  ;;  %p1676_p12 = por %p1675_p9, %p1674_p5 }
  0x6f   : > { %p1677_p3 = pnand %p1676_p12, %p1670_p6 }
  0x71   : > { %1680 = shalt.err (!%p1677_p3)
}
  0x72   : > { %1418 = dma.hbm_to_vmem [thread:$0]  (!%p1973_p7), %s1971_s27, 128, %s377_s30, %s366_s1  }
  0x73   : > { %p2172_p10 = scmp.ne.s32.totalorder %s2160_s20, 0 }
  0x74   : > { %s1994_s3 = sand.u32 (!%p2172_p10), 1, %s1749_s14   ;;  %p2173_p1 = scmp.ne.s32.totalorder (!%p2172_p10), %s2168_s17, 0 }
  0x75   : > { %385 = sbr.rel (%p2172_p10) target bundleno = 1479 (0x5c7), region = 60  ;;  %s1175_s5 = sshll.u32 (!%p2172_p10), %s1994_s3, 3 }
  0x76   : > { %s388_s21 = scalar_lea.sflag (!%p2172_p10), [#allocation3], %s1994_s3  ;;  %s1998_s6 = scalar_lea.vmem (!%p2172_p10), [#allocation2], %s1175_s5 }
  0x7a   : > { %1724 = dma.done.wait (%p2173_p1), %s388_s21, 128  }
  0x7b   : > { %1726 = vsyncadd (%p2173_p1), %s388_s21, 4294967168  ;;  %p2174_p3 = scmp.eq.s32.totalorder %s1847_s19, 0 }
  0x7d   : > { %1728 = dma.done.wait (%p2174_p3), [#allocation6], 2048   ;;  %p2175_p4 = pmov %p2174_p3 }
  0x7e   : > { %p2176_p12 = pmov %p2174_p3 }
  0x7f   : > { %1730 = vsyncadd (%p2175_p4), [#allocation6], 4294965248 }
  0x80   : > { %1732 = dma.done.wait (%p2176_p12), [#allocation9], 2048   ;;  %p2177_p6 = pmov %p2174_p3 }
  0x81   : > { %p2178_p2 = pmov %p2174_p3 }
  0x82   : > { %1734 = vsyncadd (%p2177_p6), [#allocation9], 4294965248 }
  0x83   : > { %1736 = dma.done.wait (%p2178_p2), [#allocation12], 1024   ;;  %p2179_p7 = pmov %p2178_p2 }
  0x84   : > { %v1767_v0 = vmov 0.0   ;;  %vm1768_vm0 = vmmov 0   ;;  %v1479_v1 = vld [vmem:[#allocation5 + $0x38] sm:$0xff]   ;;  %v1480_v2 = vld [vmem:[#allocation5 + $0x30] sm:$0xff]   ;;  %v1481_v3 = vld [vmem:[#allocation5 + $0x28] sm:$0xff]   ;;  %v1769_v46 = vmov 32  }
  0x85   : > { %1738 = vsyncadd (%p2179_p7), [#allocation12], 4294966272  ;;  %1273 = vmatprep.subr.bf16.mxu0 %v1767_v0  ;;  %1289 = vmatprep.mubr.msk.bf16.mxu0 %vm1768_vm0, %v1767_v0  ;;  %v1487_v4 = vld [vmem:[#allocation7 + $0x38] sm:$0xff]   ;;  %v1482_v5 = vld [vmem:[#allocation5 + $0x20] sm:$0xff]   ;;  %s1373_s27 = smul.u32 24, %s1994_s3  ;;  %p2180_p11 = scmp.ne.s32.totalorder %s2169_s28, 0 }
  0x86   : > { %1293 = vmatprep.subr.bf16.mxu1 %v1767_v0  ;;  %1309 = vmatprep.mubr.msk.bf16.mxu1 %vm1768_vm0, %v1767_v0  ;;  %v1488_v6 = vld [vmem:[#allocation7 + $0x30] sm:$0xff]   ;;  %v1483_v7 = vld [vmem:[#allocation5 + $0x18] sm:$0xff]   ;;  %v1489_v8 = vld [vmem:[#allocation7 + $0x28] sm:$0xff]   ;;  %s1374_s24 = smul.u32 384, %s1847_s19  ;;  %s1032_s19 = scalar_lea.sflag [#allocation4], %s1994_s3 }
  0x87   : > { %1274 = vmatpush3.bf16.msra.mxu0 %v1479_v1  ;;  %1294 = vmatpush3.bf16.msra.mxu1 %v1487_v4  ;;  %v1484_v9 = vld [vmem:[#allocation5 + $0x10] sm:$0xff]   ;;  %v1490_v10 = vld [vmem:[#allocation7 + $0x20] sm:$0xff]   ;;  %v1485_v11 = vld [vmem:[#allocation5 + $0x8] sm:$0xff]   ;;  %s2070_s30 = scalar_lea.vmem [#allocation13], %s1373_s27  ;;  %s1770_s8 = smov [#allocation13]  }
  0x88   : > { %1275 = vmatprep.subr.bf16.mxu0 %v1767_v0  ;;  %1295 = vmatprep.subr.bf16.mxu1 %v1767_v0  ;;  %v1491_v12 = vld [vmem:[#allocation7 + $0x18] sm:$0xff]   ;;  %v1486_v13 = vld [vmem:[#allocation5] sm:$0xff]   ;;  %v1492_v15 = vld [vmem:[#allocation7 + $0x10] sm:$0xff]   ;;  %s1046_s29 = sshll.u32 %s2070_s30, 4  ;;  %s1685_s20 = sshll.u32 %s1770_s8, 4  ;;  %s2098_s29 = int_to_ptr.vmem [resolvable:$true] %s1046_s29  ;;  %s1686_s20 = int_to_ptr.vmem [resolvable:$false] %s1685_s20 }
  0x89   : > { %v2032_v14 = vld [vmem:[%s1998_s6] sm:$0xff]  ;;  %v1493_v17 = vld [vmem:[#allocation7 + $0x8] sm:$0xff]   ;;  %v1494_v18 = vld [vmem:[#allocation7] sm:$0xff]   ;;  %1477 = vset.pattern.permute.xlu1 %v1769_v46  ;;  %1478 = vset.pattern.permute.xlu0 %v1769_v46  ;;  %s2096_s6 = scalar_lea.hbm %s2150_s10, %s1374_s24  ;;  %s1681_s1 = scalar_lea.vmem %s2098_s29, 384 }
  0x8a   : > { %v450_v16 = vpack.c.bf16 %v2032_v14, %v2032_v14  ;;  %v1181_v19 = vld [vmem:[%s2142_s2] ss:$0 sm:$0xff]  ;;  %v1495_v33 = vld [vmem:[#allocation8 + $0x38] sm:$0xff]   ;;  %v1497_v35 = vld [vmem:[#allocation8 + $0x28] sm:$0xff]   ;;  %791 = vperm.xlu1 %1477, %v2032_v14   ;;  %v795_v47 = vsub.f32 1.0, %v2032_v14  ;;  %p1682_p8 = scmp.ne.s32.totalorder %s2098_s29, %s1681_s1  ;;  %s1687_s17 = scalar_lea.vmem %s1686_s20, 768 }
  0x8b   : > { %1276 = vmatpush3.bf16.msra.mxu0 %v1480_v2  ;;  %1296 = vmatpush3.bf16.msra.mxu1 %v1488_v6  ;;  %v1190_v27 = vld [vmem:[%s2144_s4] ss:$0 sm:$0xff]  ;;  %v1498_v36 = vld [vmem:[#allocation8 + $0x20] sm:$0xff]   ;;  %v1499_v41 = vld [vmem:[#allocation8 + $0x18] sm:$0xff]   ;;  %p1688_p5 = scmp.lt.s32.totalorder %s2098_s29, %s1686_s20  ;;  %p1689_p9 = scmp.lt.s32.totalorder %s1687_s17, %s1681_s1 }
  0x8c   : > { %1277 = vmatprep.subr.bf16.mxu0 %v1767_v0  ;;  %1297 = vmatprep.subr.bf16.mxu1 %v1767_v0  ;;  %v1496_v34 = vld [vmem:[#allocation8 + $0x30] sm:$0xff]   ;;  %v1501_v43 = vld [vmem:[#allocation8 + $0x8] sm:$0xff]   ;;  %v1502_v44 = vld [vmem:[#allocation8] sm:$0xff]   ;;  %p1683_p0 = pnand %p1682_p8, %p2180_p11 }
  0x8d   : > { %v1500_v42 = vld [vmem:[#allocation8 + $0x10] sm:$0xff]   ;;  %v1503_v45 = vld [vmem:[#allocation10 + $0x38] sm:$0xff]   ;;  %v1505_v49 = vld [vmem:[#allocation10 + $0x28] sm:$0xff]   ;;  %p1690_p10 = por %p1689_p9, %p1688_p5 }
  0x8e   : > { %v1504_v48 = vld [vmem:[#allocation10 + $0x30] sm:$0xff]   ;;  %798 = vperm.xlu1 %1477, %v795_v47   ;;  %v1506_v50 = vld [vmem:[#allocation10 + $0x20] sm:$0xff]   ;;  %v1507_v51 = vld [vmem:[#allocation10 + $0x18] sm:$0xff]   ;;  %p1684_p13 = pneg %p1683_p0 }
  0x8f   : > { %1278 = vmatpush3.bf16.msra.mxu0 %v1481_v3  ;;  %1298 = vmatpush3.bf16.msra.mxu1 %v1489_v8  ;;  %v1508_v52 = vld [vmem:[#allocation10 + $0x10] sm:$0xff]   ;;  %v1509_v57 = vld [vmem:[#allocation10 + $0x8] sm:$0xff]   ;;  %v1510_v58 = vld [vmem:[#allocation10] sm:$0xff]  }
  0x90   : > { %1279 = vmatprep.subr.bf16.mxu0 %v1767_v0  ;;  %1299 = vmatprep.subr.bf16.mxu1 %v1767_v0  ;;  %v1511_v59 = vld [vmem:[#allocation11 + $0x38] sm:$0xff]   ;;  %v1512_v60 = vld [vmem:[#allocation11 + $0x30] sm:$0xff]   ;;  %v1513_v61 = vld [vmem:[#allocation11 + $0x28] sm:$0xff]   ;;  %p1691_p1 = pnand %p1690_p10, %p1684_p13 }
  0x91   : > { %v1514_v62 = vld [vmem:[#allocation11 + $0x20] sm:$0xff]   ;;  %v1515_v63 = vld [vmem:[#allocation11 + $0x18] sm:$0xff]   ;;  %v1516_v1 = vld [vmem:[#allocation11 + $0x10] sm:$0xff]  }
  0x93   : > { %1280 = vmatpush3.bf16.msra.mxu0 %v1482_v5  ;;  %1300 = vmatpush3.bf16.msra.mxu1 %v1490_v10 }
  0x94   : > { %1281 = vmatprep.subr.bf16.mxu0 %v1767_v0  ;;  %1301 = vmatprep.subr.bf16.mxu1 %v1767_v0 }
  0x97   : > { %1282 = vmatpush3.bf16.msra.mxu0 %v1483_v7  ;;  %1302 = vmatpush3.bf16.msra.mxu1 %v1491_v12  ;;  %v1517_v12 = vld [vmem:[#allocation11 + $0x8] sm:$0xff]  }
  0x98   : > { %1283 = vmatprep.subr.bf16.mxu0 %v1767_v0  ;;  %1303 = vmatprep.subr.bf16.mxu1 %v1767_v0 }
  0x9b   : > { %1284 = vmatpush3.bf16.msra.mxu0 %v1484_v9  ;;  %1304 = vmatpush3.bf16.msra.mxu1 %v1492_v15 }
  0x9c   : > { %1285 = vmatprep.subr.bf16.mxu0 %v1767_v0  ;;  %1305 = vmatprep.subr.bf16.mxu1 %v1767_v0 }
  0x9f   : > { %1286 = vmatpush3.bf16.msra.mxu0 %v1485_v11  ;;  %1306 = vmatpush3.bf16.msra.mxu1 %v1493_v17 }
  0xa0   : > { %1287 = vmatprep.subr.bf16.mxu0 %v1767_v0  ;;  %1307 = vmatprep.subr.bf16.mxu1 %v1767_v0 }
  0xa3   : > { %1288 = vmatpush3.bf16.msra.mxu0 %v1486_v13  ;;  %1308 = vmatpush3.bf16.msra.mxu1 %v1494_v18  ;;  %v1518_v13 = vld [vmem:[#allocation11] sm:$0xff]  }
  0xa4   : > { %1313 = vmatprep.subr.bf16.mxu0 %v1767_v0  ;;  %1333 = vmatprep.subr.bf16.mxu1 %v1767_v0 }
  0xa6   : > { %1290 = vmatmul.mubr.bf16.vlgmr.msra.gmra.mxu0 %v450_v16 }
  0xa7   : > { %1329 = vmatprep.mubr.msk.bf16.mxu0 %vm1768_vm0, %v1767_v0  ;;  %1314 = vmatpush3.bf16.msra.mxu0 %v1495_v33 }
  0xa8   : > { %1315 = vmatprep.subr.bf16.mxu0 %v1767_v0 }
  0xab   : > { %1316 = vmatpush3.bf16.msra.mxu0 %v1496_v34 }
  0xac   : > { %1317 = vmatprep.subr.bf16.mxu0 %v1767_v0 }
  0xaf   : > { %1318 = vmatpush3.bf16.msra.mxu0 %v1497_v35 }
  0xb0   : > { %1319 = vmatprep.subr.bf16.mxu0 %v1767_v0 }
  0xb3   : > { %1320 = vmatpush3.bf16.msra.mxu0 %v1498_v36 }
  0xb4   : > { %1321 = vmatprep.subr.bf16.mxu0 %v1767_v0 }
  0xb7   : > { %1322 = vmatpush3.bf16.msra.mxu0 %v1499_v41 }
  0xb8   : > { %1323 = vmatprep.subr.bf16.mxu0 %v1767_v0 }
  0xbb   : > { %1324 = vmatpush3.bf16.msra.mxu0 %v1500_v42 }
  0xbc   : > { %1325 = vmatprep.subr.bf16.mxu0 %v1767_v0 }
  0xbf   : > { %1326 = vmatpush3.bf16.msra.mxu0 %v1501_v43 }
  0xc0   : > { %1327 = vmatprep.subr.bf16.mxu0 %v1767_v0 }
  0xc3   : > { %1328 = vmatpush3.bf16.msra.mxu0 %v1502_v44 }
  0xc4   : > { %1353 = vmatprep.subr.bf16.mxu0 %v1767_v0 }
 0x105   : > { %v792_v2 = vpop.permute.xlu1 %791 }
 0x109   : > { %v799_v3 = vpop.permute.xlu1 %798 }
 0x10a   : > { %v801_v5 = vmul.f32 %v799_v3, %v2032_v14  ;;  %v1207_v14 = vld [vmem:[%s2147_s7] ss:$0 sm:$0xff] }
 0x166   : > { %v556_v20 = vpop.f32.mrf.mxu0 }
 0x167   : > { %v557_v21 = vadd.f32 %v1181_v19, %v556_v20 }
 0x168   : > { %v1291_v22 = vpop.f32.mrf.mxu0 }
 0x169   : > { %v562_v23 = vmax.f32 %v557_v21, 0.0 }
 0x16a   : > { %v559_v24 = vpop.f32.mrf.mxu0 }
 0x16b   : > { %v563_v25 = vpack.c.bf16 %v562_v23, %v562_v23 }
 0x16c   : > { %v1292_v26 = vpop.f32.mrf.mxu0 }
 0x16d   : > { %1310 = vmatmul.mubr.bf16.vlgmr.msra.gmra.mxu1 %v563_v25 }
 0x16e   : > { %1349 = vmatprep.mubr.msk.bf16.mxu1 %vm1768_vm0, %v1767_v0  ;;  %1334 = vmatpush3.bf16.msra.mxu1 %v1503_v45 }
 0x16f   : > { %1335 = vmatprep.subr.bf16.mxu1 %v1767_v0 }
 0x172   : > { %1336 = vmatpush3.bf16.msra.mxu1 %v1504_v48 }
 0x173   : > { %1337 = vmatprep.subr.bf16.mxu1 %v1767_v0 }
 0x176   : > { %1338 = vmatpush3.bf16.msra.mxu1 %v1505_v49 }
 0x177   : > { %1339 = vmatprep.subr.bf16.mxu1 %v1767_v0 }
 0x17a   : > { %1340 = vmatpush3.bf16.msra.mxu1 %v1506_v50 }
 0x17b   : > { %1341 = vmatprep.subr.bf16.mxu1 %v1767_v0 }
 0x17e   : > { %1342 = vmatpush3.bf16.msra.mxu1 %v1507_v51 }
 0x17f   : > { %1343 = vmatprep.subr.bf16.mxu1 %v1767_v0 }
 0x182   : > { %1344 = vmatpush3.bf16.msra.mxu1 %v1508_v52 }
 0x183   : > { %1345 = vmatprep.subr.bf16.mxu1 %v1767_v0 }
 0x186   : > { %1346 = vmatpush3.bf16.msra.mxu1 %v1509_v57 }
 0x187   : > { %1347 = vmatprep.subr.bf16.mxu1 %v1767_v0 }
 0x18a   : > { %1348 = vmatpush3.bf16.msra.mxu1 %v1510_v58 }
 0x22d   : > { %v669_v28 = vpop.f32.mrf.mxu1 }
 0x22e   : > { %v670_v29 = vadd.f32 %v1190_v27, %v669_v28 }
 0x22f   : > { %v1311_v30 = vpop.f32.mrf.mxu1 }
 0x230   : > { %675 = vmax.xlane.f32.xlu0 %v670_v29 }
 0x231   : > { %v672_v31 = vpop.f32.mrf.mxu1 }
 0x233   : > { %v1312_v32 = vpop.f32.mrf.mxu1 }
 0x2b9   : > { %v676_v37 = vpop.xlane.xlu0 %675 }
 0x2ba   : > { %v677_v38 = vsub.f32 %v670_v29, %v676_v37 }
 0x2bc   : > { %v678_v39 = vmul.f32 1.442695, %v677_v38 }
 0x2be   : > { %1519 = vpow2.f32 %v678_v39 }
 0x2cb   : > { %v1520_v40 = vpop.eup %1519 }
 0x2cc   : > { %680 = vadd.xlane.f32.xlu0 %v1520_v40 }
 0x355   : > { %v681_v53 = vpop.xlane.xlu0 %680 }
 0x356   : > { %1521 = vrcp.f32 %v681_v53 }
 0x363   : > { %v1522_v54 = vpop.eup %1521 }
 0x364   : > { %v683_v55 = vmul.f32 %v1522_v54, %v1520_v40 }
 0x366   : > { %v684_v56 = vpack.c.bf16 %v683_v55, %v683_v55  ;;  %1029 = vst [vmem:[%s2070_s30 + $0x8] sm:$0xff] %v683_v55 }
 0x368   : > { %1330 = vmatmul.mubr.bf16.vlgmr.msra.gmra.mxu0 %v684_v56 }
 0x369   : > { %1369 = vmatprep.mubr.msk.bf16.mxu0 %vm1768_vm0, %v1767_v0  ;;  %1354 = vmatpush3.bf16.msra.mxu0 %v1511_v59 }
 0x36a   : > { %1355 = vmatprep.subr.bf16.mxu0 %v1767_v0 }
 0x36d   : > { %1356 = vmatpush3.bf16.msra.mxu0 %v1512_v60 }
 0x36e   : > { %1357 = vmatprep.subr.bf16.mxu0 %v1767_v0 }
 0x371   : > { %1358 = vmatpush3.bf16.msra.mxu0 %v1513_v61 }
 0x372   : > { %1359 = vmatprep.subr.bf16.mxu0 %v1767_v0 }
 0x375   : > { %1360 = vmatpush3.bf16.msra.mxu0 %v1514_v62 }
 0x376   : > { %1361 = vmatprep.subr.bf16.mxu0 %v1767_v0 }
 0x379   : > { %1362 = vmatpush3.bf16.msra.mxu0 %v1515_v63 }
 0x37a   : > { %1363 = vmatprep.subr.bf16.mxu0 %v1767_v0 }
 0x37d   : > { %1364 = vmatpush3.bf16.msra.mxu0 %v1516_v1 }
 0x37e   : > { %1365 = vmatprep.subr.bf16.mxu0 %v1767_v0 }
 0x381   : > { %1366 = vmatpush3.bf16.msra.mxu0 %v1517_v12 }
 0x382   : > { %1367 = vmatprep.subr.bf16.mxu0 %v1767_v0  ;;  %v1216_v0 = vld [vmem:[%s2149_s9] ss:$0 sm:$0xff] }
 0x385   : > { %1368 = vmatpush3.bf16.msra.mxu0 %v1518_v13 }
 0x428   : > { %v783_v4 = vpop.f32.mrf.mxu0 }
 0x429   : > { %v794_v6 = vmul.f32 %v792_v2, %v783_v4 }
 0x42a   : > { %v1331_v7 = vpop.f32.mrf.mxu0 }
 0x42b   : > { %v802_v8 = vadd.f32 %v801_v5, %v794_v6 }
 0x42c   : > { %v786_v9 = vpop.f32.mrf.mxu0 }
 0x42d   : > { %v803_v10 = vpack.c.bf16 %v802_v8, %v802_v8  ;;  %1028 = vst [vmem:[%s2070_s30] sm:$0xff] %v802_v8 }
 0x42e   : > { %v1332_v11 = vpop.f32.mrf.mxu0 }
 0x42f   : > { %1350 = vmatmul.mubr.bf16.vlgmr.msra.gmra.mxu1 %v803_v10 }
 0x4ef   : > { %v909_v15 = vpop.f32.mrf.mxu1 }
 0x4f0   : > { %v910_v16 = vadd.f32 %v1207_v14, %v909_v15 }
 0x4f1   : > { %v1351_v17 = vpop.f32.mrf.mxu1 }
 0x4f2   : > { %v915_v18 = vmax.f32 %v910_v16, 0.0 }
 0x4f3   : > { %v912_v19 = vpop.f32.mrf.mxu1 }
 0x4f4   : > { %v916_v20 = vpack.c.bf16 %v915_v18, %v915_v18 }
 0x4f5   : > { %v1352_v21 = vpop.f32.mrf.mxu1 }
 0x4f6   : > { %1370 = vmatmul.mubr.bf16.vlgmr.msra.gmra.mxu0 %v916_v20 }
 0x5b6   : > { %v1022_v22 = vpop.f32.mrf.mxu0 }
 0x5b7   : > { %v1023_v23 = vadd.f32 %v1216_v0, %v1022_v22 }
 0x5b8   : > { %v1371_v24 = vpop.f32.mrf.mxu0 }
 0x5b9   : > { %1030 = vst [vmem:[%s2070_s30 + $0x10] sm:$0xff] %v1023_v23 }
 0x5ba   : > { %v1025_v25 = vpop.f32.mrf.mxu0 }
 0x5bb   : > { %1694 = shalt.err (!%p1691_p1)
}
 0x5bc   : > { %s1695_s27 = scalar_lea.hbm %s2096_s6, 384  ;;  %s1699_s23 = scalar_lea.hbm %s2150_s10, 768 }
 0x5bd   : > { %p1696_p3 = scmp.ne.s32.totalorder %s2096_s6, %s1695_s27  ;;  %p1700_p6 = scmp.lt.s32.totalorder %s2096_s6, %s2150_s10 }
 0x5be   : > { %p1701_p2 = scmp.lt.s32.totalorder %s1699_s23, %s1695_s27 }
 0x5bf   : > { %p1697_p4 = pnand %p1696_p3, %p2180_p11 }
 0x5c0   : > { %p1702_p7 = por %p1701_p2, %p1700_p6 }
 0x5c1   : > { %p1698_p12 = pneg %p1697_p4 }
 0x5c3   : > { %p1703_p8 = pnand %p1702_p7, %p1698_p12 }
 0x5c5   : > { %1706 = shalt.err (!%p1703_p8)
}
 0x5c6   : > { %1397 = dma.vmem_to_hbm [thread:$0]  (%p2180_p11), %s2098_s29, 384, %s2096_s6, %s1032_s19   ;;  %v1372_v26 = vpop.f32.mrf.mxu0 }
 0x5c7 PF: > { %s1058_s25 = sand.u32 1, %s1745_s13   ;;  %p2181_p0 = scmp.ne.s32.totalorder %s2170_s12, 0 }
 0x5c8   : > { %p2182_p13 = scmp.ge.s32.totalorder %s1757_s16, 2  ;;  %s1059_s22 = scalar_lea.sflag [#allocation4], %s1058_s25 }
 0x5ca   : > { %p1420_p5 = pnand %p2182_p13, %p2181_p0 }
 0x5cc   : > { %p1421_p9 = pneg %p1420_p5 }
 0x5ce   : > { %1740 = dma.done.wait (%p1421_p9), %s1059_s22, 384  }
 0x5cf   : > { %1742 = vsyncadd (%p1421_p9), %s1059_s22, 4294966912  ;;  %p26_p10 = scmp.ge.s32.totalorder %s1937_s26, 4   ;;  %s2183_s13 = smov %s1749_s14 }
 0x5d0   : > { %s2184_s14 = smov %s1753_s15  ;;  %s2185_s15 = smov %s1949_s11 }
 0x5d1   : > { %s2186_s16 = smov %s1937_s26  ;;  %28 = sbr.rel (!%p26_p10) target bundleno = 14 (0xe), region = 125 }
 0x5d6   :  { %1064 = vsyncpa [#allocation3], 1 }
 0x5d7   :  { %1066 = vsyncpa [#allocation3 + $0x1], 1 }
 0x5d8   :  { %1067 = vsyncpa [#allocation6], 1 }
 0x5d9   :  { %1068 = vsyncpa [#allocation9], 1 }
 0x5da   :  { %1069 = vsyncpa [#allocation12], 1 }
 0x5db   :  { %1070 = vsyncpa [#allocation4], 1 }
 0x5dc   :  { %1072 = vsyncpa [#allocation4 + $0x1], 1 }

</bundles_post_ra>
